<compile_context>
chip_gen: v6e
topology: v6e:2x2x1
jax: 0.10.0
libtpu: 0.0.40
codegen_flags: <defaults>
</compile_context>

<pallas_src>
import math

import jax
import jax.numpy as jnp
from jax.experimental import pallas as pl
from jax.experimental.pallas import tpu as pltpu

H1, H2 = 512, 256  # hidden widths of the discriminator MLP


def _round_up(x, m):
    return ((x + m - 1) // m) * m


def _discriminator_kernel(x_ref, w1_ref, b1_ref, w2_ref, b2_ref,
                          w3_ref, b3_ref, out_ref):
    # x: (TB, D) bf16
    x = x_ref[...]

    # ---- Linear(D, 512) + LeakyReLU(0.2) ----  (MXU, bf16 in / f32 acc)
    h1 = jnp.dot(x, w1_ref[...], preferred_element_type=jnp.float32)
    h1 = h1 + b1_ref[...]                       # (TB, 512) + (1, 512)
    h1 = jnp.where(h1 > 0, h1, 0.2 * h1)

    # ---- Linear(512, 256) + LeakyReLU(0.2) ----  (MXU, bf16 in / f32 acc)
    h2 = jnp.dot(h1.astype(jnp.bfloat16), w2_ref[...],
                 preferred_element_type=jnp.float32)
    h2 = h2 + b2_ref[...]                       # (TB, 256) + (1, 256)
    h2 = jnp.where(h2 > 0, h2, 0.2 * h2)

    # ---- Linear(256, 1) ----  N=1: skip the MXU, VPU multiply + lane reduce
    h3 = jnp.sum(h2 * w3_ref[...], axis=-1, keepdims=True)   # (TB, 1)
    h3 = h3 + b3_ref[0]                         # scalar bias from SMEM

    # ---- Sigmoid ----  exp on the EUP, approximate reciprocal on the EUP
    out_ref[...] = pl.reciprocal(1.0 + jnp.exp(-h3),
                                 approx=True).astype(out_ref.dtype)


def discriminator_forward(img, params):
    """img: (B, C, H, W) float32. Returns (B, 1) validity scores."""
    b = img.shape[0]
    x = img.reshape(b, -1).astype(jnp.float32)  # row-major flatten == torch .view
    d = x.shape[1]
    w1, b1, w2, b2, w3, b3 = params

    # bf16 on the MXU path, f32 biases / last-layer weights.
    x_bf = x.astype(jnp.bfloat16)
    w1_bf = w1.astype(jnp.bfloat16)
    w2_bf = w2.astype(jnp.bfloat16)
    w3_row = w3.reshape(1, -1).astype(jnp.float32)   # (1, 256) row for VPU reduce
    b1r = b1.reshape(1, -1).astype(jnp.float32)
    b2r = b2.reshape(1, -1).astype(jnp.float32)
    b3s = b3.reshape(-1).astype(jnp.float32)          # (1,) scalar -> SMEM

    # Batch tiling: pad to a sublane-friendly multiple, cap the tile at the
    # MXU row count so big batches pipeline across the grid.
    tb = min(128, _round_up(b, 16))
    b_pad = _round_up(b, tb)
    if b_pad != b:
        x_bf = jnp.pad(x_bf, ((0, b_pad - b), (0, 0)))
    n_tiles = b_pad // tb

    out = pl.pallas_call(
        _discriminator_kernel,
        out_shape=jax.ShapeDtypeStruct((b_pad, 1), jnp.float32),
        grid_spec=pltpu.PrefetchScalarGridSpec(
            num_scalar_prefetch=0,
            grid=(n_tiles,),
            in_specs=[
                # x: one batch tile per grid step (double-buffered by Pallas).
                pl.BlockSpec((tb, d), lambda i: (i, 0)),
                # Weights / biases: constant block index -> loaded once,
                # VMEM-resident across the whole batch grid.
                pl.BlockSpec((d, H1), lambda i: (0, 0)),
                pl.BlockSpec((1, H1), lambda i: (0, 0)),
                pl.BlockSpec((H1, H2), lambda i: (0, 0)),
                pl.BlockSpec((1, H2), lambda i: (0, 0)),
                pl.BlockSpec((1, H2), lambda i: (0, 0)),
                # Scalar bias b3 in SMEM (no padded VMEM tile).
                pl.BlockSpec(memory_space=pltpu.MemorySpace.SMEM),
            ],
            out_specs=pl.BlockSpec((tb, 1), lambda i: (i, 0)),
        ),
        compiler_params=pltpu.CompilerParams(
            dimension_semantics=("parallel",)),
    )(x_bf, w1_bf, b1r, w2_bf, b2r, w3_row, b3s)

    return out[:b]


def init_params(key, in_features):
    """PyTorch-style nn.Linear init: U(-1/sqrt(fan_in), 1/sqrt(fan_in)).

    NOTE: weights are stored (fan_in, fan_out), i.e. transposed relative to
    PyTorch nn.Linear's (out, in) storage; transpose real checkpoints.
    """
    dims = [(in_features, H1), (H1, H2), (H2, 1)]
    params = []
    for fan_in, fan_out in dims:
        key, kw, kb = jax.random.split(key, 3)
        bound = 1.0 / math.sqrt(fan_in)
        w = jax.random.uniform(kw, (fan_in, fan_out), jnp.float32,
                               minval=-bound, maxval=bound)
        bvec = jax.random.uniform(kb, (fan_out,), jnp.float32,
                                  minval=-bound, maxval=bound)
        params.extend([w, bvec])
    return tuple(params)


if __name__ == "__main__":
    key = jax.random.PRNGKey(0)
    # Small image shape consistent with the module: img_shape = (1, 16, 16)
    B, C, H, W = 2, 1, 16, 16
    D = C * H * W

    key, k_img = jax.random.split(key)
    img = jax.random.normal(k_img, (B, C, H, W), jnp.float32)

    params = init_params(key, D)

    validity = discriminator_forward(img, params)
    validity = jax.block_until_ready(validity)

    # Reference computed with the same bf16 matmul inputs / f32 accumulation
    # as the kernel (the kernel intentionally runs the MXU path in bf16).
    w1, b1, w2, b2, w3, b3 = params
    xf = img.reshape(B, -1)
    h = jnp.dot(xf.astype(jnp.bfloat16), w1.astype(jnp.bfloat16),
                preferred_element_type=jnp.float32) + b1
    h = jnp.where(h > 0, h, 0.2 * h)
    h = jnp.dot(h.astype(jnp.bfloat16), w2.astype(jnp.bfloat16),
                preferred_element_type=jnp.float32) + b2
    h = jnp.where(h > 0, h, 0.2 * h)
    logit = jnp.sum(h * w3.reshape(1, -1), axis=-1, keepdims=True) + b3
    ref = jax.nn.sigmoid(logit)

    assert validity.shape == (B, 1)
    assert jnp.allclose(validity, ref, atol=5e-3, rtol=5e-3), (
        jnp.max(jnp.abs(validity - ref)))
    print("KERNEL_OK")
</pallas_src>

<mosaic_0001>
module attributes {stable_mosaic.version = 11 : i64} {
  func.func @_discriminator_kernel(%arg0: i32, %arg1: memref<16x256xbf16, #tpu.memory_space<vmem>>, %arg2: memref<256x512xbf16, #tpu.memory_space<vmem>>, %arg3: memref<1x512xf32, #tpu.memory_space<vmem>>, %arg4: memref<512x256xbf16, #tpu.memory_space<vmem>>, %arg5: memref<1x256xf32, #tpu.memory_space<vmem>>, %arg6: memref<1x256xf32, #tpu.memory_space<vmem>>, %arg7: memref<1xf32, #tpu.memory_space<smem>>, %arg8: memref<16x1xf32, #tpu.memory_space<vmem>>) attributes {dimension_semantics = [#tpu.dimension_semantics<parallel>], iteration_bounds = array<i64: 1>, scalar_prefetch = 0 : i64, scratch_operands = 0 : i64, tpu.core_type = #tpu.core_type<tc>, window_params = [{transform_indices = @transform_0, window_bounds = array<i64: 16, 256>}, {pipeline_mode = #tpu.pipeline_mode<synchronous>, transform_indices = @transform_1, window_bounds = array<i64: 256, 512>}, {pipeline_mode = #tpu.pipeline_mode<synchronous>, transform_indices = @transform_2, window_bounds = array<i64: 1, 512>}, {pipeline_mode = #tpu.pipeline_mode<synchronous>, transform_indices = @transform_3, window_bounds = array<i64: 512, 256>}, {pipeline_mode = #tpu.pipeline_mode<synchronous>, transform_indices = @transform_4, window_bounds = array<i64: 1, 256>}, {pipeline_mode = #tpu.pipeline_mode<synchronous>, transform_indices = @transform_5, window_bounds = array<i64: 1, 256>}, {transform_indices = @transform_6, window_bounds = array<i64: 1>}, {transform_indices = @transform_7, window_bounds = array<i64: 16, 1>}]} {
    %c0 = arith.constant 0 : index
    %c0_0 = arith.constant 0 : index
    %0 = vector.load %arg1[%c0, %c0_0] : memref<16x256xbf16, #tpu.memory_space<vmem>>, vector<16x256xbf16>
    %c0_1 = arith.constant 0 : index
    %c0_2 = arith.constant 0 : index
    %1 = vector.load %arg2[%c0_1, %c0_2] : memref<256x512xbf16, #tpu.memory_space<vmem>>, vector<256x512xbf16>
    %cst = arith.constant dense<0.000000e+00> : vector<16x512xf32>
    %2 = tpu.matmul %0, %1, %cst {dimension_numbers = #tpu.dot_dimension_numbers<[1], [0], [0], [1], [0, 0, 1, 1], [], []>} : vector<16x256xbf16>, vector<256x512xbf16>, vector<16x512xf32> -> vector<16x512xf32>
    %c0_3 = arith.constant 0 : index
    %c0_4 = arith.constant 0 : index
    %3 = vector.load %arg3[%c0_3, %c0_4] : memref<1x512xf32, #tpu.memory_space<vmem>>, vector<1x512xf32>
    %4 = vector.broadcast %3 : vector<1x512xf32> to vector<16x512xf32>
    %5 = arith.addf %2, %4 : vector<16x512xf32>
    %cst_5 = arith.constant 0.000000e+00 : f32
    %6 = vector.broadcast %cst_5 : f32 to vector<16x512xf32>
    %7 = arith.cmpf ogt, %5, %6 : vector<16x512xf32>
    %cst_6 = arith.constant 2.000000e-01 : f32
    %8 = vector.broadcast %cst_6 : f32 to vector<16x512xf32>
    %9 = arith.mulf %8, %5 : vector<16x512xf32>
    %10 = arith.select %7, %5, %9 : vector<16x512xi1>, vector<16x512xf32>
    %11 = arith.truncf %10 : vector<16x512xf32> to vector<16x512xbf16>
    %c0_7 = arith.constant 0 : index
    %c0_8 = arith.constant 0 : index
    %12 = vector.load %arg4[%c0_7, %c0_8] : memref<512x256xbf16, #tpu.memory_space<vmem>>, vector<512x256xbf16>
    %cst_9 = arith.constant dense<0.000000e+00> : vector<16x256xf32>
    %13 = tpu.matmul %11, %12, %cst_9 {dimension_numbers = #tpu.dot_dimension_numbers<[1], [0], [0], [1], [0, 0, 1, 1], [], []>} : vector<16x512xbf16>, vector<512x256xbf16>, vector<16x256xf32> -> vector<16x256xf32>
    %c0_10 = arith.constant 0 : index
    %c0_11 = arith.constant 0 : index
    %14 = vector.load %arg5[%c0_10, %c0_11] : memref<1x256xf32, #tpu.memory_space<vmem>>, vector<1x256xf32>
    %15 = vector.broadcast %14 : vector<1x256xf32> to vector<16x256xf32>
    %16 = arith.addf %13, %15 : vector<16x256xf32>
    %cst_12 = arith.constant 0.000000e+00 : f32
    %17 = vector.broadcast %cst_12 : f32 to vector<16x256xf32>
    %18 = arith.cmpf ogt, %16, %17 : vector<16x256xf32>
    %cst_13 = arith.constant 2.000000e-01 : f32
    %19 = vector.broadcast %cst_13 : f32 to vector<16x256xf32>
    %20 = arith.mulf %19, %16 : vector<16x256xf32>
    %21 = arith.select %18, %16, %20 : vector<16x256xi1>, vector<16x256xf32>
    %c0_14 = arith.constant 0 : index
    %c0_15 = arith.constant 0 : index
    %22 = vector.load %arg6[%c0_14, %c0_15] : memref<1x256xf32, #tpu.memory_space<vmem>>, vector<1x256xf32>
    %23 = vector.broadcast %22 : vector<1x256xf32> to vector<16x256xf32>
    %24 = arith.mulf %21, %23 : vector<16x256xf32>
    %cst_16 = arith.constant dense<0.000000e+00> : vector<16xf32>
    %25 = vector.multi_reduction <add>, %24, %cst_16 [1] : vector<16x256xf32> to vector<16xf32>
    %26 = vector.shape_cast %25 : vector<16xf32> to vector<16x1xf32>
    %c0_17 = arith.constant 0 : index
    %27 = memref.load %arg7[%c0_17] : memref<1xf32, #tpu.memory_space<smem>>
    %28 = vector.broadcast %27 : f32 to vector<16x1xf32>
    %29 = arith.addf %26, %28 : vector<16x1xf32>
    %cst_18 = arith.constant 0.000000e+00 : f32
    %30 = vector.broadcast %cst_18 : f32 to vector<16x1xf32>
    %31 = arith.subf %30, %29 : vector<16x1xf32>
    %32 = math.exp %31 : vector<16x1xf32>
    %cst_19 = arith.constant 1.000000e+00 : f32
    %33 = vector.broadcast %cst_19 : f32 to vector<16x1xf32>
    %34 = arith.addf %33, %32 : vector<16x1xf32>
    %35 = tpu.reciprocal %34 {approx = true} : vector<16x1xf32> -> vector<16x1xf32>
    %c0_20 = arith.constant 0 : index
    %c0_21 = arith.constant 0 : index
    %36 = vector.load %arg8[%c0_20, %c0_21] : memref<16x1xf32, #tpu.memory_space<vmem>>, vector<16x1xf32>
    tpu.vector_store %arg8[%c0_20, %c0_21], %35 {strides = array<i32>} : memref<16x1xf32, #tpu.memory_space<vmem>>, vector<16x1xf32>,
    return
  }
  func.func @transform_0(%arg0: i32) -> (i32, i32) {
    %c0_i32 = arith.constant 0 : i32
    %c0_i32_0 = arith.constant 0 : i32
    return %arg0, %c0_i32 : i32, i32
  }
  func.func @transform_1(%arg0: i32) -> (i32, i32) {
    %c0_i32 = arith.constant 0 : i32
    %c0_i32_0 = arith.constant 0 : i32
    %c0_i32_1 = arith.constant 0 : i32
    return %c0_i32, %c0_i32_0 : i32, i32
  }
  func.func @transform_2(%arg0: i32) -> (i32, i32) {
    %c0_i32 = arith.constant 0 : i32
    %c0_i32_0 = arith.constant 0 : i32
    %c0_i32_1 = arith.constant 0 : i32
    return %c0_i32, %c0_i32_0 : i32, i32
  }
  func.func @transform_3(%arg0: i32) -> (i32, i32) {
    %c0_i32 = arith.constant 0 : i32
    %c0_i32_0 = arith.constant 0 : i32
    %c0_i32_1 = arith.constant 0 : i32
    return %c0_i32, %c0_i32_0 : i32, i32
  }
  func.func @transform_4(%arg0: i32) -> (i32, i32) {
    %c0_i32 = arith.constant 0 : i32
    %c0_i32_0 = arith.constant 0 : i32
    %c0_i32_1 = arith.constant 0 : i32
    return %c0_i32, %c0_i32_0 : i32, i32
  }
  func.func @transform_5(%arg0: i32) -> (i32, i32) {
    %c0_i32 = arith.constant 0 : i32
    %c0_i32_0 = arith.constant 0 : i32
    %c0_i32_1 = arith.constant 0 : i32
    return %c0_i32, %c0_i32_0 : i32, i32
  }
  func.func @transform_6(%arg0: i32) -> i32 {
    %c0_i32 = arith.constant 0 : i32
    %c0_i32_0 = arith.constant 0 : i32
    return %c0_i32 : i32
  }
  func.func @transform_7(%arg0: i32) -> (i32, i32) {
    %c0_i32 = arith.constant 0 : i32
    %c0_i32_0 = arith.constant 0 : i32
    return %arg0, %c0_i32 : i32, i32
  }
}

</mosaic_0001>

<bundles_post_ra>
// kernel: tpu_custom_call.1
= control target key start
LH: loop header
LB: loop body
LE: loop exit
PB: predicated region body
PF: predicated region fallthrough
CT: control target
= control target key end

     0   :  { %13 = vsyncpa [#allocation4], 0  ;;  %s1628_s0 = inlined_call_operand.hbm [shape: bf16[16,256], index: 0, kind: input, shape index: {}]   ;;  %s1629_s1 = inlined_call_operand.hbm [shape: bf16[256,512], index: 1, kind: input, shape index: {}]   ;;  %s1630_s2 = inlined_call_operand.vmem [shape: f32[1,512], index: 2, kind: input, shape index: {}]   ;;  %s1631_s3 = inlined_call_operand.hbm [shape: bf16[512,256], index: 3, kind: input, shape index: {}]   ;;  %s1632_s4 = inlined_call_operand.vmem [shape: f32[1,256], index: 4, kind: input, shape index: {}]   ;;  %s1633_s5 = inlined_call_operand.vmem [shape: f32[1,256], index: 5, kind: input, shape index: {}]   ;;  %s1634_s6 = inlined_call_operand.<no memory space> [shape: f32[1], index: 6, kind: input, shape index: {}]   ;;  %s1635_s7 = inlined_call_operand.vmem [shape: f32[16,1], index: 7, kind: output, shape index: {}]  }
   0x1   :  { %14 = vsyncpa [#allocation6], 0  ;;  %s1543_s24 = smov [#allocation5]  }
   0x2   :  { %s32_s25 = sshll.u32 %s1543_s24, 4  ;;  %s33_s25 = int_to_ptr.vmem [resolvable:$true] %s32_s25 }
   0x3   :  { %s1487_s26 = scalar_lea.vmem %s33_s25, 8192  ;;  %p1492_p1 = scmp.lt.s32.totalorder %s33_s25, %s33_s25 }
   0x4   :  { %p1488_p0 = scmp.ne.s32.totalorder %s33_s25, %s1487_s26  ;;  %p1493_p2 = scmp.lt.s32.totalorder %s1487_s26, %s1487_s26 }
   0x6   :  { %p1494_p3 = por %p1493_p2, %p1492_p1 }
   0x8   :  { %p1495_p4 = pnand %p1494_p3, %p1488_p0 }
   0xa   :  { %1498 = shalt.err (!%p1495_p4)
}
   0xb   :  { %s1544_s27 = smov 256   ;;  %s1545_s28 = smov 16  }
   0xc   :  { %38 = dma.hbm_to_vmem [thread:$0]  %s1629_s1, 8192, %s33_s25, [#allocation6], %s1544_s27, %s1544_s27, %s1545_s28  }
   0xd   :  { %s1546_s8 = smov [#allocation3]  }
   0xe   :  { %s20_s9 = sshll.u32 %s1546_s8, 4  ;;  %s21_s9 = int_to_ptr.vmem [resolvable:$true] %s20_s9 }
   0xf   :  { %s1507_s10 = scalar_lea.vmem %s21_s9, 256  ;;  %p1512_p6 = scmp.lt.s32.totalorder %s21_s9, %s21_s9 }
  0x10   :  { %p1508_p5 = scmp.ne.s32.totalorder %s21_s9, %s1507_s10  ;;  %p1513_p7 = scmp.lt.s32.totalorder %s1507_s10, %s1507_s10 }
  0x12   :  { %p1514_p8 = por %p1513_p7, %p1512_p6 }
  0x14   :  { %p1515_p9 = pnand %p1514_p8, %p1508_p5 }
  0x16   :  { %1518 = shalt.err (!%p1515_p9)
}
  0x17   :  { %s1547_s11 = smov 128   ;;  %s1548_s12 = smov 8  }
  0x18   :  { %26 = dma.hbm_to_vmem [thread:$0]  %s1628_s0, 256, %s21_s9, [#allocation4], %s1547_s11, %s1547_s11, %s1548_s12  }
  0x19   :  { %s1549_s15 = smov [#allocation7]  }
  0x1a   :  { %s46_s16 = sshll.u32 %s1549_s15, 4  ;;  %s47_s16 = int_to_ptr.vmem [resolvable:$true] %s46_s16 }
  0x1b   :  { %s1527_s1 = scalar_lea.vmem %s47_s16, 8192  ;;  %p1532_p11 = scmp.lt.s32.totalorder %s47_s16, %s47_s16 }
  0x1c   :  { %p1528_p10 = scmp.ne.s32.totalorder %s47_s16, %s1527_s1  ;;  %p1533_p12 = scmp.lt.s32.totalorder %s1527_s1, %s1527_s1 }
  0x1e   :  { %p1534_p13 = por %p1533_p12, %p1532_p11 }
  0x20   :  { %p1535_p0 = pnand %p1534_p13, %p1528_p10 }
  0x22   :  { %1538 = shalt.err (!%p1535_p0)
}
  0x23   :  { %52 = dma.hbm_to_vmem [thread:$0]  %s1631_s3, 8192, %s47_s16, [#allocation6], %s1547_s11, %s1547_s11, %s1548_s12  }
  0x24   :  { %1539 = dma.done.wait [#allocation4], 256  }
  0x25   :  { %1540 = vsyncadd [#allocation4], 4294967040 }
  0x26   :  { %1541 = dma.done.wait [#allocation6], 16384  }
  0x27   :  { %1542 = vsyncadd [#allocation6], 4294950912  ;;  %v1276_v0 = vld [vmem:[#allocation5 + $0xe4] ss:$16 sps:$4 sm:$0xff]   ;;  %v1278_v1 = vld [vmem:[#allocation5 + $0xec] ss:$16 sps:$4 sm:$0xff]  }
  0x28   :  { %486 = vmatprep.subr.bf16.mxu0 %v1276_v0  ;;  %v1280_v2 = vld [vmem:[#allocation5 + $0xe0] ss:$16 sps:$4 sm:$0xff]   ;;  %v1281_v3 = vld [vmem:[#allocation5 + $0xe8] ss:$16 sps:$4 sm:$0xff]   ;;  %529 = vmatprep.subr.bf16.mxu1 %v1278_v1  ;;  %v1282_v4 = vld [vmem:[#allocation5 + $0xc4] ss:$16 sps:$4 sm:$0xff]  }
  0x29   :  { %487 = vmatpush1.bf16.msra.mxu0 %v1280_v2  ;;  %530 = vmatpush1.bf16.msra.mxu1 %v1281_v3  ;;  %v1284_v5 = vld [vmem:[#allocation5 + $0xcc] ss:$16 sps:$4 sm:$0xff]   ;;  %v1286_v6 = vld [vmem:[#allocation5 + $0xc0] ss:$16 sps:$4 sm:$0xff]   ;;  %v1287_v7 = vld [vmem:[#allocation5 + $0xc8] ss:$16 sps:$4 sm:$0xff]  }
  0x2a   :  { %488 = vmatprep.subr.bf16.mxu0 %v1282_v4  ;;  %531 = vmatprep.subr.bf16.mxu1 %v1284_v5  ;;  %v1288_v8 = vld [vmem:[#allocation5 + $0xa4] ss:$16 sps:$4 sm:$0xff]   ;;  %v1290_v9 = vld [vmem:[#allocation5 + $0xac] ss:$16 sps:$4 sm:$0xff]   ;;  %v1292_v10 = vld [vmem:[#allocation5 + $0xa0] ss:$16 sps:$4 sm:$0xff]  }
  0x2b   :  { %v1293_v11 = vld [vmem:[#allocation5 + $0xa8] ss:$16 sps:$4 sm:$0xff]   ;;  %v1294_v12 = vld [vmem:[#allocation5 + $0x84] ss:$16 sps:$4 sm:$0xff]   ;;  %v1296_v13 = vld [vmem:[#allocation5 + $0x8c] ss:$16 sps:$4 sm:$0xff]  }
  0x2c   :  { %v1298_v14 = vld [vmem:[#allocation5 + $0x80] ss:$16 sps:$4 sm:$0xff]   ;;  %v1299_v15 = vld [vmem:[#allocation5 + $0x88] ss:$16 sps:$4 sm:$0xff]   ;;  %v1300_v16 = vld [vmem:[#allocation5 + $0x64] ss:$16 sps:$4 sm:$0xff]  }
  0x2d   :  { %489 = vmatpush1.bf16.msra.mxu0 %v1286_v6  ;;  %532 = vmatpush1.bf16.msra.mxu1 %v1287_v7  ;;  %v1302_v17 = vld [vmem:[#allocation5 + $0x6c] ss:$16 sps:$4 sm:$0xff]   ;;  %v1304_v18 = vld [vmem:[#allocation5 + $0x60] ss:$16 sps:$4 sm:$0xff]   ;;  %v1305_v19 = vld [vmem:[#allocation5 + $0x68] ss:$16 sps:$4 sm:$0xff]  }
  0x2e   :  { %490 = vmatprep.subr.bf16.mxu0 %v1288_v8  ;;  %533 = vmatprep.subr.bf16.mxu1 %v1290_v9  ;;  %v1306_v20 = vld [vmem:[#allocation5 + $0x44] ss:$16 sps:$4 sm:$0xff]   ;;  %v1308_v21 = vld [vmem:[#allocation5 + $0x4c] ss:$16 sps:$4 sm:$0xff]   ;;  %v1310_v22 = vld [vmem:[#allocation5 + $0x40] ss:$16 sps:$4 sm:$0xff]  }
  0x2f   :  { %v1311_v23 = vld [vmem:[#allocation5 + $0x48] ss:$16 sps:$4 sm:$0xff]   ;;  %v1312_v24 = vld [vmem:[#allocation5 + $0x24] ss:$16 sps:$4 sm:$0xff]   ;;  %v1314_v25 = vld [vmem:[#allocation5 + $0x2c] ss:$16 sps:$4 sm:$0xff]  }
  0x30   :  { %v1316_v26 = vld [vmem:[#allocation5 + $0x20] ss:$16 sps:$4 sm:$0xff]   ;;  %v1317_v27 = vld [vmem:[#allocation5 + $0x28] ss:$16 sps:$4 sm:$0xff]   ;;  %v1318_v28 = vld [vmem:[#allocation5 + $0x4] ss:$16 sps:$4 sm:$0xff]  }
  0x31   :  { %491 = vmatpush1.bf16.msra.mxu0 %v1292_v10  ;;  %534 = vmatpush1.bf16.msra.mxu1 %v1293_v11  ;;  %v1320_v29 = vld [vmem:[#allocation5 + $0xc] ss:$16 sps:$4 sm:$0xff]   ;;  %v1322_v30 = vld [vmem:[#allocation5] ss:$16 sps:$4 sm:$0xff]   ;;  %v1323_v31 = vld [vmem:[#allocation5 + $0x8] ss:$16 sps:$4 sm:$0xff]  }
  0x32   :  { %492 = vmatprep.subr.bf16.mxu0 %v1294_v12  ;;  %535 = vmatprep.subr.bf16.mxu1 %v1296_v13  ;;  %v1324_v32 = vld [vmem:[#allocation5 + $0x1e4] ss:$16 sps:$4 sm:$0xff]   ;;  %v1326_v33 = vld [vmem:[#allocation5 + $0x1ec] ss:$16 sps:$4 sm:$0xff]   ;;  %v1328_v34 = vld [vmem:[#allocation5 + $0x1e0] ss:$16 sps:$4 sm:$0xff]  }
  0x33   :  { %v1329_v35 = vld [vmem:[#allocation5 + $0x1e8] ss:$16 sps:$4 sm:$0xff]   ;;  %v1330_v36 = vld [vmem:[#allocation5 + $0x1c4] ss:$16 sps:$4 sm:$0xff]   ;;  %v1332_v37 = vld [vmem:[#allocation5 + $0x1cc] ss:$16 sps:$4 sm:$0xff]  }
  0x34   :  { %v1334_v38 = vld [vmem:[#allocation5 + $0x1c0] ss:$16 sps:$4 sm:$0xff]   ;;  %v1335_v39 = vld [vmem:[#allocation5 + $0x1c8] ss:$16 sps:$4 sm:$0xff]   ;;  %v1336_v40 = vld [vmem:[#allocation5 + $0x1a4] ss:$16 sps:$4 sm:$0xff]  }
  0x35   :  { %493 = vmatpush1.bf16.msra.mxu0 %v1298_v14  ;;  %536 = vmatpush1.bf16.msra.mxu1 %v1299_v15  ;;  %v1338_v41 = vld [vmem:[#allocation5 + $0x1ac] ss:$16 sps:$4 sm:$0xff]   ;;  %v1340_v42 = vld [vmem:[#allocation5 + $0x1a0] ss:$16 sps:$4 sm:$0xff]   ;;  %v1341_v43 = vld [vmem:[#allocation5 + $0x1a8] ss:$16 sps:$4 sm:$0xff]  }
  0x36   :  { %494 = vmatprep.subr.bf16.mxu0 %v1300_v16  ;;  %537 = vmatprep.subr.bf16.mxu1 %v1302_v17  ;;  %v1342_v44 = vld [vmem:[#allocation5 + $0x184] ss:$16 sps:$4 sm:$0xff]   ;;  %v1344_v45 = vld [vmem:[#allocation5 + $0x18c] ss:$16 sps:$4 sm:$0xff]   ;;  %v1346_v46 = vld [vmem:[#allocation5 + $0x180] ss:$16 sps:$4 sm:$0xff]  }
  0x37   :  { %v1347_v47 = vld [vmem:[#allocation5 + $0x188] ss:$16 sps:$4 sm:$0xff]   ;;  %v1374_v48 = vld [vmem:[#allocation3 + $0x4] ss:$8 sps:$4 sm:$0xff]   ;;  %v1352_v51 = vld [vmem:[#allocation5 + $0x160] ss:$16 sps:$4 sm:$0xff]  }
  0x38   :  { %v1348_v49 = vld [vmem:[#allocation5 + $0x164] ss:$16 sps:$4 sm:$0xff]   ;;  %v1350_v50 = vld [vmem:[#allocation5 + $0x16c] ss:$16 sps:$4 sm:$0xff]   ;;  %518 = vmatprep.mubr.bf16.mxu0 %v1374_v48  ;;  %561 = vmatprep.mubr.bf16.mxu1 %v1374_v48  ;;  %v1353_v52 = vld [vmem:[#allocation5 + $0x168] ss:$16 sps:$4 sm:$0xff]  }
  0x39   :  { %495 = vmatpush1.bf16.msra.mxu0 %v1304_v18  ;;  %538 = vmatpush1.bf16.msra.mxu1 %v1305_v19  ;;  %v1354_v53 = vld [vmem:[#allocation5 + $0x144] ss:$16 sps:$4 sm:$0xff]   ;;  %v1356_v54 = vld [vmem:[#allocation5 + $0x14c] ss:$16 sps:$4 sm:$0xff]   ;;  %v1358_v55 = vld [vmem:[#allocation5 + $0x140] ss:$16 sps:$4 sm:$0xff]  }
  0x3a   :  { %496 = vmatprep.subr.bf16.mxu0 %v1306_v20  ;;  %539 = vmatprep.subr.bf16.mxu1 %v1308_v21  ;;  %v1359_v56 = vld [vmem:[#allocation5 + $0x148] ss:$16 sps:$4 sm:$0xff]   ;;  %v1360_v57 = vld [vmem:[#allocation5 + $0x124] ss:$16 sps:$4 sm:$0xff]   ;;  %v1362_v58 = vld [vmem:[#allocation5 + $0x12c] ss:$16 sps:$4 sm:$0xff]  }
  0x3b   :  { %v1364_v59 = vld [vmem:[#allocation5 + $0x120] ss:$16 sps:$4 sm:$0xff]   ;;  %v1365_v60 = vld [vmem:[#allocation5 + $0x128] ss:$16 sps:$4 sm:$0xff]   ;;  %v1366_v61 = vld [vmem:[#allocation5 + $0x104] ss:$16 sps:$4 sm:$0xff]  }
  0x3c   :  { %v1368_v62 = vld [vmem:[#allocation5 + $0x10c] ss:$16 sps:$4 sm:$0xff]   ;;  %v1370_v63 = vld [vmem:[#allocation5 + $0x100] ss:$16 sps:$4 sm:$0xff]   ;;  %v1371_v0 = vld [vmem:[#allocation5 + $0x108] ss:$16 sps:$4 sm:$0xff]  }
  0x3d   :  { %497 = vmatpush1.bf16.msra.mxu0 %v1310_v22  ;;  %540 = vmatpush1.bf16.msra.mxu1 %v1311_v23  ;;  %v1377_v1 = vld [vmem:[#allocation7 + $0x74] ss:$8 sps:$4 sm:$0xff]   ;;  %v1372_v3 = vld [vmem:[#allocation3] ss:$8 sps:$4 sm:$0xff]   ;;  %v1383_v6 = vld [vmem:[#allocation7 + $0x64] ss:$8 sps:$4 sm:$0xff]  }
  0x3e   :  { %498 = vmatprep.subr.bf16.mxu0 %v1312_v24  ;;  %541 = vmatprep.subr.bf16.mxu1 %v1314_v25  ;;  %v1380_v2 = vld [vmem:[#allocation7 + $0x174] ss:$8 sps:$4 sm:$0xff]   ;;  %v1375_v4 = vld [vmem:[#allocation7 + $0x70] ss:$8 sps:$4 sm:$0xff]   ;;  %v1386_v7 = vld [vmem:[#allocation7 + $0x164] ss:$8 sps:$4 sm:$0xff]  }
  0x3f   :  { %v1378_v5 = vld [vmem:[#allocation7 + $0x170] ss:$8 sps:$4 sm:$0xff]   ;;  %v1381_v8 = vld [vmem:[#allocation7 + $0x60] ss:$8 sps:$4 sm:$0xff]   ;;  %v1389_v10 = vld [vmem:[#allocation7 + $0x54] ss:$8 sps:$4 sm:$0xff]  }
  0x40   :  { %v1384_v9 = vld [vmem:[#allocation7 + $0x160] ss:$8 sps:$4 sm:$0xff]   ;;  %v1392_v11 = vld [vmem:[#allocation7 + $0x154] ss:$8 sps:$4 sm:$0xff]   ;;  %v1387_v12 = vld [vmem:[#allocation7 + $0x50] ss:$8 sps:$4 sm:$0xff]  }
  0x41   :  { %499 = vmatpush1.bf16.msra.mxu0 %v1316_v26  ;;  %542 = vmatpush1.bf16.msra.mxu1 %v1317_v27  ;;  %v1390_v13 = vld [vmem:[#allocation7 + $0x150] ss:$8 sps:$4 sm:$0xff]   ;;  %v1395_v14 = vld [vmem:[#allocation7 + $0x44] ss:$8 sps:$4 sm:$0xff]   ;;  %v1393_v16 = vld [vmem:[#allocation7 + $0x40] ss:$8 sps:$4 sm:$0xff]  }
  0x42   :  { %500 = vmatprep.subr.bf16.mxu0 %v1318_v28  ;;  %543 = vmatprep.subr.bf16.mxu1 %v1320_v29  ;;  %v1398_v15 = vld [vmem:[#allocation7 + $0x144] ss:$8 sps:$4 sm:$0xff]   ;;  %v1396_v17 = vld [vmem:[#allocation7 + $0x140] ss:$8 sps:$4 sm:$0xff]   ;;  %v1401_v18 = vld [vmem:[#allocation7 + $0x34] ss:$8 sps:$4 sm:$0xff]  }
  0x43   :  { %v1404_v19 = vld [vmem:[#allocation7 + $0x134] ss:$8 sps:$4 sm:$0xff]   ;;  %v1399_v20 = vld [vmem:[#allocation7 + $0x30] ss:$8 sps:$4 sm:$0xff]   ;;  %v1407_v22 = vld [vmem:[#allocation7 + $0x24] ss:$8 sps:$4 sm:$0xff]  }
  0x44   :  { %v1402_v21 = vld [vmem:[#allocation7 + $0x130] ss:$8 sps:$4 sm:$0xff]   ;;  %v1410_v23 = vld [vmem:[#allocation7 + $0x124] ss:$8 sps:$4 sm:$0xff]   ;;  %v1405_v24 = vld [vmem:[#allocation7 + $0x20] ss:$8 sps:$4 sm:$0xff]  }
  0x45   :  { %501 = vmatpush1.bf16.msra.mxu0 %v1322_v30  ;;  %544 = vmatpush1.bf16.msra.mxu1 %v1323_v31  ;;  %v1408_v25 = vld [vmem:[#allocation7 + $0x120] ss:$8 sps:$4 sm:$0xff]   ;;  %v1413_v26 = vld [vmem:[#allocation7 + $0x14] ss:$8 sps:$4 sm:$0xff]   ;;  %v1411_v28 = vld [vmem:[#allocation7 + $0x10] ss:$8 sps:$4 sm:$0xff]  }
  0x46   :  { %502 = vmatprep.subr.bf16.mxu0 %v1324_v32  ;;  %545 = vmatprep.subr.bf16.mxu1 %v1326_v33  ;;  %v1416_v27 = vld [vmem:[#allocation7 + $0x114] ss:$8 sps:$4 sm:$0xff]   ;;  %v1414_v29 = vld [vmem:[#allocation7 + $0x110] ss:$8 sps:$4 sm:$0xff]   ;;  %v1419_v30 = vld [vmem:[#allocation7 + $0x4] ss:$8 sps:$4 sm:$0xff]  }
  0x47   :  { %v1422_v31 = vld [vmem:[#allocation7 + $0x104] ss:$8 sps:$4 sm:$0xff]   ;;  %v1417_v32 = vld [vmem:[#allocation7] ss:$8 sps:$4 sm:$0xff]   ;;  %vm1130_vm12 = vcmask 7168  }
  0x48   :  { %v1420_v33 = vld [vmem:[#allocation7 + $0x100] ss:$8 sps:$4 sm:$0xff]  }
  0x49   :  { %503 = vmatpush2.bf16.msra.mxu0 %v1328_v34  ;;  %546 = vmatpush2.bf16.msra.mxu1 %v1329_v35  ;;  %v1425_v34 = vld [vmem:[#allocation7 + $0xf4] ss:$8 sps:$4 sm:$0xff]   ;;  %v1441_v48 = vld [vmem:[#allocation7 + $0xc0] ss:$8 sps:$4 sm:$0xff]  }
  0x4a   :  { %504 = vmatprep.subr.bf16.mxu0 %v1330_v36  ;;  %547 = vmatprep.subr.bf16.mxu1 %v1332_v37  ;;  %v1428_v35 = vld [vmem:[#allocation7 + $0x1f4] ss:$8 sps:$4 sm:$0xff]   ;;  %v1423_v36 = vld [vmem:[#allocation7 + $0xf0] ss:$8 sps:$4 sm:$0xff]  }
  0x4b   :  { %v1426_v37 = vld [vmem:[#allocation7 + $0x1f0] ss:$8 sps:$4 sm:$0xff]  }
  0x4d   :  { %505 = vmatpush2.bf16.msra.mxu0 %v1334_v38  ;;  %548 = vmatpush2.bf16.msra.mxu1 %v1335_v39  ;;  %v1431_v38 = vld [vmem:[#allocation7 + $0xe4] ss:$8 sps:$4 sm:$0xff]  }
  0x4e   :  { %506 = vmatprep.subr.bf16.mxu0 %v1336_v40  ;;  %549 = vmatprep.subr.bf16.mxu1 %v1338_v41  ;;  %v1434_v39 = vld [vmem:[#allocation7 + $0x1e4] ss:$8 sps:$4 sm:$0xff]   ;;  %v1429_v40 = vld [vmem:[#allocation7 + $0xe0] ss:$8 sps:$4 sm:$0xff]  }
  0x4f   :  { %v1432_v41 = vld [vmem:[#allocation7 + $0x1e0] ss:$8 sps:$4 sm:$0xff]  }
  0x51   :  { %507 = vmatpush2.bf16.msra.mxu0 %v1340_v42  ;;  %550 = vmatpush2.bf16.msra.mxu1 %v1341_v43  ;;  %v1437_v42 = vld [vmem:[#allocation7 + $0xd4] ss:$8 sps:$4 sm:$0xff]  }
  0x52   :  { %508 = vmatprep.subr.bf16.mxu0 %v1342_v44  ;;  %551 = vmatprep.subr.bf16.mxu1 %v1344_v45  ;;  %v1440_v43 = vld [vmem:[#allocation7 + $0x1d4] ss:$8 sps:$4 sm:$0xff]   ;;  %v1435_v44 = vld [vmem:[#allocation7 + $0xd0] ss:$8 sps:$4 sm:$0xff]  }
  0x53   :  { %v1438_v45 = vld [vmem:[#allocation7 + $0x1d0] ss:$8 sps:$4 sm:$0xff]  }
  0x55   :  { %509 = vmatpush2.bf16.msra.mxu0 %v1346_v46  ;;  %552 = vmatpush2.bf16.msra.mxu1 %v1347_v47  ;;  %v1443_v46 = vld [vmem:[#allocation7 + $0xc4] ss:$8 sps:$4 sm:$0xff]  }
  0x56   :  { %510 = vmatprep.subr.bf16.mxu0 %v1348_v49  ;;  %553 = vmatprep.subr.bf16.mxu1 %v1350_v50  ;;  %v1446_v47 = vld [vmem:[#allocation7 + $0x1c4] ss:$8 sps:$4 sm:$0xff]   ;;  %v1444_v49 = vld [vmem:[#allocation7 + $0x1c0] ss:$8 sps:$4 sm:$0xff]   ;;  %v1449_v50 = vld [vmem:[#allocation7 + $0xb4] ss:$8 sps:$4 sm:$0xff]  }
  0x59   :  { %511 = vmatpush2.bf16.msra.mxu0 %v1352_v51  ;;  %554 = vmatpush2.bf16.msra.mxu1 %v1353_v52  ;;  %v1452_v51 = vld [vmem:[#allocation7 + $0x1b4] ss:$8 sps:$4 sm:$0xff]   ;;  %v1447_v52 = vld [vmem:[#allocation7 + $0xb0] ss:$8 sps:$4 sm:$0xff]  }
  0x5a   :  { %512 = vmatprep.subr.bf16.mxu0 %v1354_v53  ;;  %555 = vmatprep.subr.bf16.mxu1 %v1356_v54  ;;  %v1450_v53 = vld [vmem:[#allocation7 + $0x1b0] ss:$8 sps:$4 sm:$0xff]   ;;  %v1455_v54 = vld [vmem:[#allocation7 + $0xa4] ss:$8 sps:$4 sm:$0xff]  }
  0x5d   :  { %513 = vmatpush2.bf16.msra.mxu0 %v1358_v55  ;;  %556 = vmatpush2.bf16.msra.mxu1 %v1359_v56  ;;  %v1458_v55 = vld [vmem:[#allocation7 + $0x1a4] ss:$8 sps:$4 sm:$0xff]   ;;  %v1453_v56 = vld [vmem:[#allocation7 + $0xa0] ss:$8 sps:$4 sm:$0xff]  }
  0x5e   :  { %514 = vmatprep.subr.bf16.mxu0 %v1360_v57  ;;  %557 = vmatprep.subr.bf16.mxu1 %v1362_v58  ;;  %v1456_v57 = vld [vmem:[#allocation7 + $0x1a0] ss:$8 sps:$4 sm:$0xff]   ;;  %v1461_v58 = vld [vmem:[#allocation7 + $0x94] ss:$8 sps:$4 sm:$0xff]  }
  0x61   :  { %515 = vmatpush2.bf16.msra.mxu0 %v1364_v59  ;;  %558 = vmatpush2.bf16.msra.mxu1 %v1365_v60  ;;  %v1464_v59 = vld [vmem:[#allocation7 + $0x194] ss:$8 sps:$4 sm:$0xff]   ;;  %v1459_v60 = vld [vmem:[#allocation7 + $0x90] ss:$8 sps:$4 sm:$0xff]  }
  0x62   :  { %516 = vmatprep.subr.bf16.mxu0 %v1366_v61  ;;  %559 = vmatprep.subr.bf16.mxu1 %v1368_v62  ;;  %v1462_v61 = vld [vmem:[#allocation7 + $0x190] ss:$8 sps:$4 sm:$0xff]   ;;  %v1465_v62 = vld [vmem:[#allocation7 + $0x80] ss:$8 sps:$4 sm:$0xff]  }
  0x65   :  { %517 = vmatpush2.bf16.msra.mxu0 %v1370_v63  ;;  %560 = vmatpush2.bf16.msra.mxu1 %v1371_v0  ;;  %v1467_v63 = vld [vmem:[#allocation7 + $0x84] ss:$8 sps:$4 sm:$0xff]   ;;  %v1468_v0 = vld [vmem:[#allocation7 + $0x180] ss:$8 sps:$4 sm:$0xff]  }
  0x66   :  { %996 = vmatprep.subr.bf16.mxu0 %v1377_v1  ;;  %1039 = vmatprep.subr.bf16.mxu1 %v1380_v2  ;;  %v1470_v1 = vld [vmem:[#allocation7 + $0x184] ss:$8 sps:$4 sm:$0xff]   ;;  %v136_v2 = vlaneseq }
  0x68   :  { %519 = vmatmul.mubr.bf16.vlgmr.msra.gmra.mxu0 %v1372_v3  ;;  %562 = vmatmul.mubr.bf16.vlgmr.msra.gmra.mxu1 %v1372_v3  ;;  %v137_v3 = vshrl.u32 %v136_v2, 7 }
  0x69   :  { %997 = vmatpush1.bf16.msra.mxu0 %v1375_v4  ;;  %1040 = vmatpush1.bf16.msra.mxu1 %v1378_v5  ;;  %v134_v5 = vld [vmem:[%s1630_s2] sm:$0xf] }
  0x6a   :  { %998 = vmatprep.subr.bf16.mxu0 %v1383_v6  ;;  %1041 = vmatprep.subr.bf16.mxu1 %v1386_v7  ;;  %v1599_v4 = vsub.s32 0, %v137_v3  ;;  %v1604_v6 = vsub.s32 1, %v137_v3  ;;  %v150_v7 = vsub.s32 3, %v137_v3 }
  0x6d   :  { %999 = vmatpush1.bf16.msra.mxu0 %v1381_v8  ;;  %1042 = vmatpush1.bf16.msra.mxu1 %v1384_v9  ;;  %v146_v8 = vsub.s32 2, %v137_v3  ;;  %v139_v9 = vrot.slane %v134_v5, %v1599_v4 }
  0x6e   :  { %1000 = vmatprep.subr.bf16.mxu0 %v1389_v10  ;;  %1043 = vmatprep.subr.bf16.mxu1 %v1392_v11 }
  0x71   :  { %1001 = vmatpush1.bf16.msra.mxu0 %v1387_v12  ;;  %1044 = vmatpush1.bf16.msra.mxu1 %v1390_v13  ;;  %v143_v12 = vrot.slane %v134_v5, %v1604_v6  ;;  %v151_v13 = vrot.slane %v134_v5, %v150_v7 }
  0x72   :  { %1002 = vmatprep.subr.bf16.mxu0 %v1395_v14  ;;  %1045 = vmatprep.subr.bf16.mxu1 %v1398_v15  ;;  %v147_v14 = vrot.slane %v134_v5, %v146_v8 }
  0x75   :  { %1003 = vmatpush1.bf16.msra.mxu0 %v1393_v16  ;;  %1046 = vmatpush1.bf16.msra.mxu1 %v1396_v17 }
  0x76   :  { %1004 = vmatprep.subr.bf16.mxu0 %v1401_v18  ;;  %1047 = vmatprep.subr.bf16.mxu1 %v1404_v19 }
  0x79   :  { %1005 = vmatpush1.bf16.msra.mxu0 %v1399_v20  ;;  %1048 = vmatpush1.bf16.msra.mxu1 %v1402_v21 }
  0x7a   :  { %1006 = vmatprep.subr.bf16.mxu0 %v1407_v22  ;;  %1049 = vmatprep.subr.bf16.mxu1 %v1410_v23 }
  0x7d   :  { %1007 = vmatpush1.bf16.msra.mxu0 %v1405_v24  ;;  %1050 = vmatpush1.bf16.msra.mxu1 %v1408_v25 }
  0x7e   :  { %1008 = vmatprep.subr.bf16.mxu0 %v1413_v26  ;;  %1051 = vmatprep.subr.bf16.mxu1 %v1416_v27 }
  0x81   :  { %1009 = vmatpush1.bf16.msra.mxu0 %v1411_v28  ;;  %1052 = vmatpush1.bf16.msra.mxu1 %v1414_v29 }
  0x82   :  { %1010 = vmatprep.subr.bf16.mxu0 %v1419_v30  ;;  %1053 = vmatprep.subr.bf16.mxu1 %v1422_v31 }
  0x85   :  { %1011 = vmatpush1.bf16.msra.mxu0 %v1417_v32  ;;  %1054 = vmatpush1.bf16.msra.mxu1 %v1420_v33 }
  0x86   :  { %1012 = vmatprep.subr.bf16.mxu0 %v1425_v34  ;;  %1055 = vmatprep.subr.bf16.mxu1 %v1428_v35 }
  0x89   :  { %1013 = vmatpush2.bf16.msra.mxu0 %v1423_v36  ;;  %1056 = vmatpush2.bf16.msra.mxu1 %v1426_v37 }
  0x8a   :  { %1014 = vmatprep.subr.bf16.mxu0 %v1431_v38  ;;  %1057 = vmatprep.subr.bf16.mxu1 %v1434_v39 }
  0x8d   :  { %1015 = vmatpush2.bf16.msra.mxu0 %v1429_v40  ;;  %1058 = vmatpush2.bf16.msra.mxu1 %v1432_v41 }
  0x8e   :  { %1016 = vmatprep.subr.bf16.mxu0 %v1437_v42  ;;  %1059 = vmatprep.subr.bf16.mxu1 %v1440_v43 }
  0x91   :  { %1017 = vmatpush2.bf16.msra.mxu0 %v1435_v44  ;;  %1060 = vmatpush2.bf16.msra.mxu1 %v1438_v45 }
  0x92   :  { %1018 = vmatprep.subr.bf16.mxu0 %v1443_v46  ;;  %1061 = vmatprep.subr.bf16.mxu1 %v1446_v47 }
  0x95   :  { %1019 = vmatpush2.bf16.msra.mxu0 %v1441_v48  ;;  %1062 = vmatpush2.bf16.msra.mxu1 %v1444_v49  ;;  %v664_v49 = vld [vmem:[%s1632_s4] sm:$0x3] }
  0x96   :  { %1020 = vmatprep.subr.bf16.mxu0 %v1449_v50  ;;  %1063 = vmatprep.subr.bf16.mxu1 %v1452_v51  ;;  %v669_v50 = vrot.slane %v664_v49, %v1599_v4  ;;  %v673_v51 = vrot.slane %v664_v49, %v1604_v6 }
  0x99   :  { %1021 = vmatpush2.bf16.msra.mxu0 %v1447_v52  ;;  %1064 = vmatpush2.bf16.msra.mxu1 %v1450_v53 }
  0x9a   :  { %1022 = vmatprep.subr.bf16.mxu0 %v1455_v54  ;;  %1065 = vmatprep.subr.bf16.mxu1 %v1458_v55 }
  0x9d   :  { %1023 = vmatpush2.bf16.msra.mxu0 %v1453_v56  ;;  %1066 = vmatpush2.bf16.msra.mxu1 %v1456_v57 }
  0x9e   :  { %1024 = vmatprep.subr.bf16.mxu0 %v1461_v58  ;;  %1067 = vmatprep.subr.bf16.mxu1 %v1464_v59  ;;  %v1094_v59 = vld [vmem:[%s1633_s5] sm:$0x3] }
  0x9f   :  { %v1099_v2 = vrot.slane %v1094_v59, %v1599_v4  ;;  %v1103_v3 = vrot.slane %v1094_v59, %v1604_v6 }
  0xa1   :  { %1025 = vmatpush2.bf16.msra.mxu0 %v1459_v60  ;;  %1068 = vmatpush2.bf16.msra.mxu1 %v1462_v61 }
  0xa2   :  { %1026 = vmatprep.subr.bf16.mxu0 %v1467_v63  ;;  %1069 = vmatprep.subr.bf16.mxu1 %v1470_v1 }
  0xa5   :  { %1027 = vmatpush2.bf16.msra.mxu0 %v1465_v62  ;;  %1070 = vmatpush2.bf16.msra.mxu1 %v1468_v0 }
 0x128   :  { %v520_v10 = vpop.f32.mrf.mxu0  ;;  %v563_v11 = vpop.f32.mrf.mxu1 }
 0x129   :  { %v521_v17 = vadd.f32 %v520_v10, %v139_v9  ;;  %v564_v24 = vadd.f32 %v563_v11, %v147_v14 }
 0x12a   :  { %v522_v15 = vpop.f32.mrf.mxu0  ;;  %v565_v16 = vpop.f32.mrf.mxu1 }
 0x12b   :  { %v523_v18 = vadd.f32 %v522_v15, %v143_v12  ;;  %v566_v21 = vadd.f32 %v565_v16, %v151_v13  ;;  %vm572_vm0 = vcmp.gt.f32.partialorder %v521_v17, 0.0  ;;  %v580_v32 = vmul.f32 0.2, %v521_v17 }
 0x12c   :  { %v524_v19 = vpop.f32.mrf.mxu0  ;;  %v567_v20 = vpop.f32.mrf.mxu1  ;;  %v582_v34 = vmul.f32 0.2, %v564_v24  ;;  %vm574_vm6 = vcmp.gt.f32.partialorder %v564_v24, 0.0 }
 0x12d   :  { %v525_v22 = vadd.f32 %v524_v19, %v139_v9  ;;  %v568_v23 = vadd.f32 %v567_v20, %v147_v14  ;;  %v581_v27 = vmul.f32 0.2, %v523_v18  ;;  %vm573_vm2 = vcmp.gt.f32.partialorder %v523_v18, 0.0 }
 0x12e   :  { %v526_v25 = vpop.f32.mrf.mxu0  ;;  %v569_v26 = vpop.f32.mrf.mxu1  ;;  %v583_v33 = vmul.f32 0.2, %v566_v21  ;;  %vm575_vm4 = vcmp.gt.f32.partialorder %v566_v21, 0.0  ;;  %v588_v41 = vsel %vm572_vm0, %v521_v17, %v580_v32  ;;  %v590_v45 = vsel %vm574_vm6, %v564_v24, %v582_v34 }
 0x12f   :  { %v584_v28 = vmul.f32 0.2, %v525_v22  ;;  %vm576_vm1 = vcmp.gt.f32.partialorder %v525_v22, 0.0  ;;  %v586_v29 = vmul.f32 0.2, %v568_v23  ;;  %v527_v30 = vadd.f32 %v526_v25, %v143_v12 }
 0x130   :  { %v570_v31 = vadd.f32 %v569_v26, %v151_v13  ;;  %vm578_vm3 = vcmp.gt.f32.partialorder %v568_v23, 0.0  ;;  %v589_v39 = vsel %vm573_vm2, %v523_v18, %v581_v27  ;;  %v591_v43 = vsel %vm575_vm4, %v566_v21, %v583_v33 }
 0x131   :  { %vm577_vm5 = vcmp.gt.f32.partialorder %v527_v30, 0.0  ;;  %v585_v35 = vmul.f32 0.2, %v527_v30  ;;  %v592_v36 = vsel %vm576_vm1, %v525_v22, %v584_v28  ;;  %v594_v38 = vsel %vm578_vm3, %v568_v23, %v586_v29 }
 0x132   :  { %vm579_vm7 = vcmp.gt.f32.partialorder %v570_v31, 0.0  ;;  %v587_v37 = vmul.f32 0.2, %v570_v31  ;;  %v596_v46 = vpack.c.bf16 %v592_v36, %v588_v41  ;;  %v598_v48 = vpack.c.bf16 %v594_v38, %v590_v45 }
 0x133   :  { %v593_v40 = vsel %vm577_vm5, %v527_v30, %v585_v35  ;;  %v1117_v21 = vstv %s1634_s6 }
 0x134   :  { %v597_v42 = vpack.c.bf16 %v593_v40, %v589_v39  ;;  %v595_v44 = vsel %vm579_vm7, %v570_v31, %v587_v37 }
 0x135   :  { %v599_v47 = vpack.c.bf16 %v595_v44, %v591_v43 }
 0x136   :  { %1028 = vmatprep.mubr.bf16.mxu0 %v597_v42 }
 0x137   :  { %1071 = vmatprep.mubr.bf16.mxu1 %v599_v47  ;;  %1029 = vmatmul.mubr.bf16.vlgmr.msra.gmra.mxu0 %v596_v46 }
 0x138   :  { %1072 = vmatmul.mubr.bf16.vlgmr.msra.gmra.mxu1 %v598_v48 }
 0x1f7   :  { %v1030_v52 = vpop.f32.mrf.mxu0 }
 0x1f8   :  { %v1031_v53 = vadd.f32 %v1030_v52, %v669_v50  ;;  %v1073_v54 = vpop.f32.mrf.mxu1 }
 0x1f9   :  { %v1032_v55 = vpop.f32.mrf.mxu0 }
 0x1fa   :  { %v1074_v56 = vadd.f32 %v1073_v54, %v1031_v53  ;;  %v1033_v57 = vadd.f32 %v1032_v55, %v673_v51  ;;  %v1075_v58 = vpop.f32.mrf.mxu1 }
 0x1fb   :  { %v1034_v60 = vpop.f32.mrf.mxu0 }
 0x1fc   :  { %vm1082_vm8 = vcmp.gt.f32.partialorder %v1074_v56, 0.0  ;;  %v1086_v61 = vmul.f32 0.2, %v1074_v56  ;;  %v1076_v62 = vadd.f32 %v1075_v58, %v1033_v57  ;;  %v1035_v63 = vadd.f32 %v1034_v60, %v669_v50  ;;  %v1077_v0 = vpop.f32.mrf.mxu1 }
 0x1fd   :  { %v1036_v1 = vpop.f32.mrf.mxu0 }
 0x1fe   :  { %vm1083_vm9 = vcmp.gt.f32.partialorder %v1076_v62, 0.0  ;;  %v1087_v5 = vmul.f32 0.2, %v1076_v62  ;;  %v1078_v7 = vadd.f32 %v1077_v0, %v1035_v63  ;;  %v1037_v8 = vadd.f32 %v1036_v1, %v673_v51  ;;  %v1079_v9 = vpop.f32.mrf.mxu1 }
 0x1ff   :  { %v1090_v10 = vsel %vm1082_vm8, %v1074_v56, %v1086_v61 }
 0x200   :  { %vm1084_vm10 = vcmp.gt.f32.partialorder %v1078_v7, 0.0  ;;  %v1088_v11 = vmul.f32 0.2, %v1078_v7  ;;  %v1080_v12 = vadd.f32 %v1079_v9, %v1037_v8  ;;  %v1091_v13 = vsel %vm1083_vm9, %v1076_v62, %v1087_v5 }
 0x201   :  { %v1106_v14 = vmul.f32 %v1099_v2, %v1090_v10  ;;  %v1107_v15 = vmul.f32 %v1103_v3, %v1091_v13 }
 0x202   :  { %vm1085_vm11 = vcmp.gt.f32.partialorder %v1080_v12, 0.0  ;;  %v1089_v16 = vmul.f32 0.2, %v1080_v12  ;;  %v1092_v17 = vsel %vm1084_vm10, %v1078_v7, %v1088_v11 }
 0x203   :  { %v1110_v18 = vadd.f32 %v1107_v15, %v1106_v14  ;;  %v1108_v4 = vmul.f32 %v1099_v2, %v1092_v17 }
 0x204   :  { %v1093_v19 = vsel %vm1085_vm11, %v1080_v12, %v1089_v16 }
 0x205   :  { %1111 = vadd.xlane.f32.xlu0 %v1110_v18  ;;  %v1109_v6 = vmul.f32 %v1103_v3, %v1093_v19 }
 0x207   :  { %v1113_v20 = vadd.f32 %v1109_v6, %v1108_v4 }
 0x209   :  { %1114 = vadd.xlane.f32.xlu0 %v1113_v20 }
 0x28e   :  { %v1112_v22 = vpop.xlane.xlu0 %1111 }
 0x28f   :  { %v1118_v23 = vadd.f32 %v1117_v21, %v1112_v22 }
 0x291   :  { %v1120_v24 = vsub.f32 0.0, %v1118_v23 }
 0x292   :  { %v1115_v25 = vpop.xlane.xlu0 %1114 }
 0x293   :  { %v1122_v26 = vmul.f32 1.442695, %v1120_v24  ;;  %v1119_v27 = vadd.f32 %v1117_v21, %v1115_v25 }
 0x295   :  { %1471 = vpow2.f32 %v1122_v26  ;;  %v1121_v28 = vsub.f32 0.0, %v1119_v27 }
 0x297   :  { %v1124_v29 = vmul.f32 1.442695, %v1121_v28 }
 0x299   :  { %1473 = vpow2.f32 %v1124_v29 }
 0x2a2   :  { %v1472_v30 = vpop.eup %1471 }
 0x2a3   :  { %v1126_v31 = vadd.f32 1.0, %v1472_v30 }
 0x2a5   :  { %1475 = vrcp.f32 %v1126_v31 }
 0x2a6   :  { %v1474_v32 = vpop.eup %1473 }
 0x2a7   :  { %v1127_v33 = vadd.f32 1.0, %v1474_v32 }
 0x2a9   :  { %1477 = vrcp.f32 %v1127_v33 }
 0x2b2   :  { %v1476_v34 = vpop.eup %1475 }
 0x2b3   :  { %1131 = vst.msk [vmem:[%s1635_s7] sm:$0xff] %vm1130_vm12, %v1476_v34 }
 0x2b6   :  { %v1478_v35 = vpop.eup %1477 }
 0x2b7   :  { %1132 = vst.msk [vmem:[%s1635_s7 + $0x8] sm:$0xff] %vm1130_vm12, %v1478_v35 }
 0x2b8   :  { %1137 = vsyncpa [#allocation4], 1 }
 0x2b9   :  { %1138 = vsyncpa [#allocation6], 1 }

</bundles_post_ra>
